<compile_context>
chip_gen: v6e
topology: v6e:2x2x1
jax: 0.10.0
libtpu: 0.0.40
codegen_flags: <defaults>
</compile_context>

<pallas_src>
import functools
import math

import jax
import jax.numpy as jnp
from jax.experimental import pallas as pl
from jax.experimental.pallas import tpu as pltpu

_LANE = 128


def _round_up(n, m):
    return ((n + m - 1) // m) * m


# Packed-vector row layout (single (8, P) operand):
#   row 0: gamma (BN weight)   [:H]
#   row 1: beta  (BN bias)     [:H]
#   row 2: b2    (fc2 bias)    [:O]
#   row 3: b1    (fc1 bias)    [:H]   (only used on the no-BN / B==1 path)
_ROW_GAMMA, _ROW_BETA, _ROW_B2, _ROW_B1 = 0, 1, 2, 3


def _mlp_kernel_bn(x_ref, w1t_ref, w2t_ref, vec_ref, o_ref,
                   *, neg_slope: float, eps: float, h_pad: int, o_pad: int):
    x = x_ref[...]                                               # (B, I_pad) f32
    batch = x.shape[0]

    # fc1: x @ W1t -> (B, H_pad).  b1 is dropped: BN subtracts the batch mean,
    # so (h + b1) - mean(h + b1) == h - mean(h).
    h = jnp.dot(x, w1t_ref[...], preferred_element_type=jnp.float32)

    # BatchNorm1d (training mode), single-pass sufficient statistics over the
    # batch dim: mean = E[h], var = E[h^2] - mean^2 (biased).
    inv_b = 1.0 / float(batch)
    mean = jnp.sum(h, axis=0, keepdims=True) * inv_b             # (1, H_pad)
    ms = jnp.sum(h * h, axis=0, keepdims=True) * inv_b           # E[h^2]
    var = ms - mean * mean

    vec = vec_ref[...]                                           # (8, P) f32
    gamma = vec[_ROW_GAMMA:_ROW_GAMMA + 1, :h_pad]
    beta = vec[_ROW_BETA:_ROW_BETA + 1, :h_pad]
    b2 = vec[_ROW_B2:_ROW_B2 + 1, :o_pad]

    h = (h - mean) * jax.lax.rsqrt(var + eps) * gamma + beta

    # LeakyReLU(0.3): single VALU max instead of compare+select.
    h = jnp.maximum(h, neg_slope * h)

    # fc2: h @ W2t + b2 -> (B, O_pad), lane-dense store.
    out = jnp.dot(h, w2t_ref[...], preferred_element_type=jnp.float32)
    o_ref[...] = (out + b2).astype(o_ref.dtype)


def _mlp_kernel_nobn(x_ref, w1t_ref, w2t_ref, vec_ref, o_ref,
                     *, neg_slope: float, eps: float, h_pad: int, o_pad: int):
    del eps  # unused (no BatchNorm on the B==1 path)
    x = x_ref[...]
    vec = vec_ref[...]
    b1 = vec[_ROW_B1:_ROW_B1 + 1, :h_pad]
    b2 = vec[_ROW_B2:_ROW_B2 + 1, :o_pad]

    h = jnp.dot(x, w1t_ref[...], preferred_element_type=jnp.float32) + b1
    h = jnp.maximum(h, neg_slope * h)
    out = jnp.dot(h, w2t_ref[...], preferred_element_type=jnp.float32)
    o_ref[...] = (out + b2).astype(o_ref.dtype)


def prepare_params(params):
    """One-time weight prep: transpose + lane-pad W1/W2, pack the small
    per-feature vectors into a single (8, P) operand.  Do NOT call per step."""
    w1, b1, gamma, beta, w2, b2 = params
    H, I = w1.shape
    O = w2.shape[0]
    I_pad = _round_up(I, _LANE)
    H_pad = _round_up(H, _LANE)
    O_pad = _round_up(O, _LANE)
    P = max(H_pad, O_pad)

    w1t = jnp.zeros((I_pad, H_pad), jnp.float32).at[:I, :H].set(w1.T)
    w2t = jnp.zeros((H_pad, O_pad), jnp.float32).at[:H, :O].set(w2.T)
    vec = (jnp.zeros((8, P), jnp.float32)
           .at[_ROW_GAMMA, :H].set(gamma)
           .at[_ROW_BETA, :H].set(beta)
           .at[_ROW_B2, :O].set(b2)
           .at[_ROW_B1, :H].set(b1))

    packed = (w1t, w2t, vec)
    dims = (I, H, O, I_pad, H_pad, O_pad)   # static ints, hashable
    return packed, dims


@functools.partial(jax.jit, static_argnames=("dims", "neg_slope", "eps"))
def var_bs_mlp_forward(x, packed, dims, neg_slope=0.3, eps=1e-5):
    """Forward pass matching Var_BS_MLP. x: (B, input_size) float32."""
    w1t, w2t, vec = packed
    I, H, O, I_pad, H_pad, O_pad = dims
    B = x.shape[0]

    # Lane-pad x's feature dim so the first matmul's K is 128-aligned.
    x_pad = jnp.zeros((B, I_pad), jnp.float32).at[:, :I].set(x)

    apply_bn = (B != 1)   # static shape check, mirrors `if x.shape[0] != 1`
    body = _mlp_kernel_bn if apply_bn else _mlp_kernel_nobn
    kernel = functools.partial(body, neg_slope=neg_slope, eps=eps,
                               h_pad=H_pad, o_pad=O_pad)

    vmem = pl.BlockSpec(memory_space=pltpu.MemorySpace.VMEM)
    out_pad = pl.pallas_call(
        kernel,
        out_shape=jax.ShapeDtypeStruct((B, O_pad), jnp.float32),
        in_specs=[vmem, vmem, vmem, vmem],
        out_specs=vmem,
    )(x_pad, w1t, w2t, vec)

    # Under jit this slice fuses with the surrounding ops; consumers that can
    # work on the padded (B, O_pad) slab should use `out_pad` directly.
    return out_pad[:, :O]


def init_params(key, input_size, hidden_size, output_size):
    """Deterministic PyTorch-style init: U(-1/sqrt(fan_in), 1/sqrt(fan_in))."""
    k1, k2, k3, k4 = jax.random.split(key, 4)
    bound1 = 1.0 / math.sqrt(input_size)
    bound2 = 1.0 / math.sqrt(hidden_size)
    w1 = jax.random.uniform(k1, (hidden_size, input_size), jnp.float32,
                            -bound1, bound1)
    b1 = jax.random.uniform(k2, (hidden_size,), jnp.float32, -bound1, bound1)
    gamma = jnp.ones((hidden_size,), jnp.float32)   # BatchNorm1d weight init
    beta = jnp.zeros((hidden_size,), jnp.float32)   # BatchNorm1d bias init
    w2 = jax.random.uniform(k3, (output_size, hidden_size), jnp.float32,
                            -bound2, bound2)
    b2 = jax.random.uniform(k4, (output_size,), jnp.float32, -bound2, bound2)
    return (w1, b1, gamma, beta, w2, b2)


def _reference(x, params):
    """Pure-JAX reference (mirrors the PyTorch forward)."""
    w1, b1, gamma, beta, w2, b2 = params
    h = x @ w1.T + b1
    if x.shape[0] != 1:
        mean = jnp.mean(h, axis=0, keepdims=True)
        var = jnp.mean((h - mean) ** 2, axis=0, keepdims=True)
        h = (h - mean) / jnp.sqrt(var + 1e-5) * gamma + beta
    h = jnp.where(h > 0, h, 0.3 * h)
    return h @ w2.T + b2


if __name__ == "__main__":
    key = jax.random.PRNGKey(0)
    kx, kp = jax.random.split(key)

    batch, input_size, hidden_size, output_size = 8, 16, 32, 4
    params = init_params(kp, input_size, hidden_size, output_size)
    packed, dims = prepare_params(params)   # one-time weight prep

    # BN path (B != 1)
    x = jax.random.normal(kx, (batch, input_size), jnp.float32)
    out = jax.block_until_ready(var_bs_mlp_forward(x, packed, dims))
    ref = _reference(x, params)
    assert out.shape == (batch, output_size)
    assert jnp.allclose(out, ref, atol=1e-4, rtol=1e-4), \
        "mismatch vs reference (BN path)"

    # No-BN path (B == 1), mirrors the `if x.shape[0] != 1` branch
    x1 = x[:1]
    out1 = jax.block_until_ready(var_bs_mlp_forward(x1, packed, dims))
    ref1 = _reference(x1, params)
    assert out1.shape == (1, output_size)
    assert jnp.allclose(out1, ref1, atol=1e-4, rtol=1e-4), \
        "mismatch vs reference (no-BN path)"

    print("KERNEL_OK")
</pallas_src>

<mosaic_0001>
module attributes {stable_mosaic.version = 11 : i64} {
  func.func @_mlp_kernel_bn(%arg0: memref<8x128xf32, #tpu.memory_space<vmem>>, %arg1: memref<128x128xf32, #tpu.memory_space<vmem>>, %arg2: memref<128x128xf32, #tpu.memory_space<vmem>>, %arg3: memref<8x128xf32, #tpu.memory_space<vmem>>, %arg4: memref<8x128xf32, #tpu.memory_space<vmem>>) attributes {dimension_semantics = [], scalar_prefetch = 0 : i64, scratch_operands = 0 : i64, tpu.core_type = #tpu.core_type<tc>} {
    %c0 = arith.constant 0 : index
    %c0_0 = arith.constant 0 : index
    %0 = vector.load %arg0[%c0, %c0_0] : memref<8x128xf32, #tpu.memory_space<vmem>>, vector<8x128xf32>
    %c0_1 = arith.constant 0 : index
    %c0_2 = arith.constant 0 : index
    %1 = vector.load %arg1[%c0_1, %c0_2] : memref<128x128xf32, #tpu.memory_space<vmem>>, vector<128x128xf32>
    %cst = arith.constant dense<0.000000e+00> : vector<8x128xf32>
    %2 = tpu.matmul %0, %1, %cst {dimension_numbers = #tpu.dot_dimension_numbers<[1], [0], [0], [1], [0, 0, 1, 1], [], []>} : vector<8x128xf32>, vector<128x128xf32>, vector<8x128xf32> -> vector<8x128xf32>
    %cst_3 = arith.constant dense<0.000000e+00> : vector<128xf32>
    %3 = vector.multi_reduction <add>, %2, %cst_3 [0] : vector<8x128xf32> to vector<128xf32>
    %4 = vector.shape_cast %3 : vector<128xf32> to vector<1x128xf32>
    %cst_4 = arith.constant 1.250000e-01 : f32
    %5 = vector.broadcast %cst_4 : f32 to vector<1x128xf32>
    %6 = arith.mulf %4, %5 : vector<1x128xf32>
    %7 = arith.mulf %2, %2 : vector<8x128xf32>
    %cst_5 = arith.constant dense<0.000000e+00> : vector<128xf32>
    %8 = vector.multi_reduction <add>, %7, %cst_5 [0] : vector<8x128xf32> to vector<128xf32>
    %9 = vector.shape_cast %8 : vector<128xf32> to vector<1x128xf32>
    %cst_6 = arith.constant 1.250000e-01 : f32
    %10 = vector.broadcast %cst_6 : f32 to vector<1x128xf32>
    %11 = arith.mulf %9, %10 : vector<1x128xf32>
    %12 = arith.mulf %6, %6 : vector<1x128xf32>
    %13 = arith.subf %11, %12 : vector<1x128xf32>
    %c0_7 = arith.constant 0 : index
    %c0_8 = arith.constant 0 : index
    %14 = vector.load %arg3[%c0_7, %c0_8] : memref<8x128xf32, #tpu.memory_space<vmem>>, vector<8x128xf32>
    %15 = vector.extract_strided_slice %14 {offsets = [0, 0], sizes = [1, 128], strides = [1, 1]} : vector<8x128xf32> to vector<1x128xf32>
    %16 = vector.extract_strided_slice %14 {offsets = [1, 0], sizes = [1, 128], strides = [1, 1]} : vector<8x128xf32> to vector<1x128xf32>
    %17 = vector.extract_strided_slice %14 {offsets = [2, 0], sizes = [1, 128], strides = [1, 1]} : vector<8x128xf32> to vector<1x128xf32>
    %18 = vector.broadcast %6 : vector<1x128xf32> to vector<8x128xf32>
    %19 = arith.subf %2, %18 : vector<8x128xf32>
    %cst_9 = arith.constant 9.99999974E-6 : f32
    %20 = vector.broadcast %cst_9 : f32 to vector<1x128xf32>
    %21 = arith.addf %13, %20 : vector<1x128xf32>
    %22 = math.rsqrt %21 : vector<1x128xf32>
    %23 = vector.broadcast %22 : vector<1x128xf32> to vector<8x128xf32>
    %24 = arith.mulf %19, %23 : vector<8x128xf32>
    %25 = vector.broadcast %15 : vector<1x128xf32> to vector<8x128xf32>
    %26 = arith.mulf %24, %25 : vector<8x128xf32>
    %27 = vector.broadcast %16 : vector<1x128xf32> to vector<8x128xf32>
    %28 = arith.addf %26, %27 : vector<8x128xf32>
    %cst_10 = arith.constant 3.000000e-01 : f32
    %29 = vector.broadcast %cst_10 : f32 to vector<8x128xf32>
    %30 = arith.mulf %29, %28 : vector<8x128xf32>
    %31 = arith.maximumf %28, %30 : vector<8x128xf32>
    %c0_11 = arith.constant 0 : index
    %c0_12 = arith.constant 0 : index
    %32 = vector.load %arg2[%c0_11, %c0_12] : memref<128x128xf32, #tpu.memory_space<vmem>>, vector<128x128xf32>
    %cst_13 = arith.constant dense<0.000000e+00> : vector<8x128xf32>
    %33 = tpu.matmul %31, %32, %cst_13 {dimension_numbers = #tpu.dot_dimension_numbers<[1], [0], [0], [1], [0, 0, 1, 1], [], []>} : vector<8x128xf32>, vector<128x128xf32>, vector<8x128xf32> -> vector<8x128xf32>
    %34 = vector.broadcast %17 : vector<1x128xf32> to vector<8x128xf32>
    %35 = arith.addf %33, %34 : vector<8x128xf32>
    %c0_14 = arith.constant 0 : index
    %c0_15 = arith.constant 0 : index
    %36 = vector.load %arg4[%c0_14, %c0_15] : memref<8x128xf32, #tpu.memory_space<vmem>>, vector<8x128xf32>
    tpu.vector_store %arg4[%c0_14, %c0_15], %35 {strides = array<i32>} : memref<8x128xf32, #tpu.memory_space<vmem>>, vector<8x128xf32>,
    return
  }
}

</mosaic_0001>

<bundles_post_ra>
// kernel: var_bs_mlp_forward.1
= control target key start
LH: loop header
LB: loop body
LE: loop exit
PB: predicated region body
PF: predicated region fallthrough
CT: control target
= control target key end

     0   :  { %9 = vsyncpa [#allocation3], 0  ;;  %s499_s0 = inlined_call_operand.vmem [shape: f32[8,128], index: 0, kind: input, shape index: {}]   ;;  %s500_s1 = inlined_call_operand.hbm [shape: f32[128,128], index: 1, kind: input, shape index: {}]   ;;  %s501_s2 = inlined_call_operand.hbm [shape: f32[128,128], index: 2, kind: input, shape index: {}]   ;;  %s502_s3 = inlined_call_operand.vmem [shape: f32[8,128], index: 3, kind: input, shape index: {}]   ;;  %s503_s4 = inlined_call_operand.vmem [shape: f32[8,128], index: 4, kind: output, shape index: {}]  }
   0x1   :  { %10 = vsyncpa [#allocation5], 0  ;;  %s419_s15 = smov [#allocation2]  }
   0x2   :  { %s18_s16 = sshll.u32 %s419_s15, 4  ;;  %s19_s16 = int_to_ptr.vmem [resolvable:$true] %s18_s16 }
   0x3   :  { %s383_s17 = scalar_lea.vmem %s19_s16, 2048  ;;  %p388_p1 = scmp.lt.s32.totalorder %s19_s16, %s19_s16 }
   0x4   :  { %p384_p0 = scmp.ne.s32.totalorder %s19_s16, %s383_s17  ;;  %p389_p2 = scmp.lt.s32.totalorder %s383_s17, %s383_s17 }
   0x6   :  { %p390_p3 = por %p389_p2, %p388_p1 }
   0x8   :  { %p391_p4 = pnand %p390_p3, %p384_p0 }
   0xa   :  { %394 = shalt.err (!%p391_p4)
}
   0xb   :  { %s420_s18 = smov 128   ;;  %s421_s19 = smov 8  }
   0xc   :  { %24 = dma.hbm_to_vmem [thread:$0]  %s500_s1, 2048, %s19_s16, [#allocation3], %s420_s18, %s420_s18, %s421_s19  }
   0xd   :  { %s422_s22 = smov [#allocation4]  }
   0xe   :  { %s30_s23 = sshll.u32 %s422_s22, 4  ;;  %s31_s23 = int_to_ptr.vmem [resolvable:$true] %s30_s23 }
   0xf   :  { %s403_s24 = scalar_lea.vmem %s31_s23, 2048  ;;  %p408_p6 = scmp.lt.s32.totalorder %s31_s23, %s31_s23 }
  0x10   :  { %p404_p5 = scmp.ne.s32.totalorder %s31_s23, %s403_s24  ;;  %p409_p7 = scmp.lt.s32.totalorder %s403_s24, %s403_s24 }
  0x12   :  { %p410_p8 = por %p409_p7, %p408_p6 }
  0x14   :  { %p411_p9 = pnand %p410_p8, %p404_p5 }
  0x16   :  { %414 = shalt.err (!%p411_p9)
}
  0x17   :  { %36 = dma.hbm_to_vmem [thread:$0]  %s501_s2, 2048, %s31_s23, [#allocation5], %s420_s18, %s420_s18, %s421_s19  }
  0x18   :  { %415 = dma.done.wait [#allocation3], 2048  }
  0x19   :  { %416 = vsyncadd [#allocation3], 4294965248 }
  0x1a   :  { %417 = dma.done.wait [#allocation5], 2048  }
  0x1b   :  { %418 = vsyncadd [#allocation5], 4294965248  ;;  %v423_v0 = vmov 0.0   ;;  %vm424_vm0 = vmmov 0   ;;  %v61_v1 = vld [vmem:[#allocation2 + $0x78] sm:$0xff]  ;;  %v60_v2 = vld [vmem:[#allocation2 + $0x70] sm:$0xff]  ;;  %v154_v33 = vlaneseq }
  0x1c   :  { %297 = vmatprep.subr.mxu0 %v423_v0  ;;  %329 = vmatprep.mubr.msk.f32.mxu0 %vm424_vm0, %v423_v0  ;;  %v59_v3 = vld [vmem:[#allocation2 + $0x68] sm:$0xff]  ;;  %v58_v4 = vld [vmem:[#allocation2 + $0x60] sm:$0xff]  ;;  %v57_v5 = vld [vmem:[#allocation2 + $0x58] sm:$0xff] }
  0x1d   :  { %332 = vmatprep.subr.mxu1 %v423_v0  ;;  %364 = vmatprep.mubr.msk.f32.mxu1 %vm424_vm0, %v423_v0  ;;  %v56_v6 = vld [vmem:[#allocation2 + $0x50] sm:$0xff]  ;;  %v55_v7 = vld [vmem:[#allocation2 + $0x48] sm:$0xff]  ;;  %v54_v8 = vld [vmem:[#allocation2 + $0x40] sm:$0xff]  ;;  %v155_v35 = vshrl.u32 %v154_v33, 7 }
  0x1e   :  { %298 = vmatpush3.msra.mxu0 %v61_v1  ;;  %v53_v9 = vld [vmem:[#allocation2 + $0x38] sm:$0xff]  ;;  %v52_v10 = vld [vmem:[#allocation2 + $0x30] sm:$0xff]  ;;  %v51_v11 = vld [vmem:[#allocation2 + $0x28] sm:$0xff] }
  0x1f   :  { %299 = vmatprep.subr.mxu0 %v423_v0  ;;  %v50_v12 = vld [vmem:[#allocation2 + $0x20] sm:$0xff]  ;;  %v49_v13 = vld [vmem:[#allocation2 + $0x18] sm:$0xff]  ;;  %v48_v14 = vld [vmem:[#allocation2 + $0x10] sm:$0xff]  ;;  %v184_v36 = vsub.s32 2, %v155_v35  ;;  %v156_v59 = vsub.s32 0, %v155_v35  ;;  %v161_v60 = vsub.s32 1, %v155_v35 }
  0x20   :  { %300 = vmatpush3.msra.mxu0 %v60_v2  ;;  %v47_v15 = vld [vmem:[#allocation2 + $0x8] sm:$0xff]  ;;  %v46_v16 = vld [vmem:[#allocation2] sm:$0xff]  ;;  %v181_v18 = vld [vmem:[#allocation4 + $0x78] sm:$0xff] }
  0x21   :  { %301 = vmatprep.subr.mxu0 %v423_v0  ;;  %v45_v17 = vld [vmem:[%s499_s0] sm:$0xff]  ;;  %333 = vmatpush3.msra.mxu1 %v181_v18  ;;  %v180_v19 = vld [vmem:[#allocation4 + $0x70] sm:$0xff]  ;;  %v179_v20 = vld [vmem:[#allocation4 + $0x68] sm:$0xff] }
  0x22   :  { %302 = vmatpush3.msra.mxu0 %v59_v3  ;;  %334 = vmatprep.subr.mxu1 %v423_v0  ;;  %v178_v21 = vld [vmem:[#allocation4 + $0x60] sm:$0xff]  ;;  %v177_v22 = vld [vmem:[#allocation4 + $0x58] sm:$0xff]  ;;  %v176_v23 = vld [vmem:[#allocation4 + $0x50] sm:$0xff] }
  0x23   :  { %303 = vmatprep.subr.mxu0 %v423_v0  ;;  %335 = vmatpush3.msra.mxu1 %v180_v19  ;;  %v175_v24 = vld [vmem:[#allocation4 + $0x48] sm:$0xff]  ;;  %v174_v25 = vld [vmem:[#allocation4 + $0x40] sm:$0xff]  ;;  %v173_v26 = vld [vmem:[#allocation4 + $0x38] sm:$0xff] }
  0x24   :  { %304 = vmatpush3.msra.mxu0 %v58_v4  ;;  %336 = vmatprep.subr.mxu1 %v423_v0  ;;  %v172_v27 = vld [vmem:[#allocation4 + $0x30] sm:$0xff]  ;;  %v171_v28 = vld [vmem:[#allocation4 + $0x28] sm:$0xff]  ;;  %v170_v29 = vld [vmem:[#allocation4 + $0x20] sm:$0xff] }
  0x25   :  { %305 = vmatprep.subr.mxu0 %v423_v0  ;;  %337 = vmatpush3.msra.mxu1 %v179_v20  ;;  %v169_v30 = vld [vmem:[#allocation4 + $0x18] sm:$0xff]  ;;  %v168_v31 = vld [vmem:[#allocation4 + $0x10] sm:$0xff]  ;;  %v167_v32 = vld [vmem:[#allocation4 + $0x8] sm:$0xff] }
  0x26   :  { %306 = vmatpush3.msra.mxu0 %v57_v5  ;;  %338 = vmatprep.subr.mxu1 %v423_v0  ;;  %v166_v34 = vld [vmem:[#allocation4] sm:$0xff] }
  0x27   :  { %307 = vmatprep.subr.mxu0 %v423_v0  ;;  %339 = vmatpush3.msra.mxu1 %v178_v21  ;;  %v149_v37 = vld [vmem:[%s502_s3] sm:$0xff] }
  0x28   :  { %308 = vmatpush3.msra.mxu0 %v56_v6  ;;  %340 = vmatprep.subr.mxu1 %v423_v0  ;;  %v185_v38 = vrot.slane %v149_v37, %v184_v36  ;;  %v157_v62 = vrot.slane %v149_v37, %v156_v59  ;;  %v162_v1 = vrot.slane %v149_v37, %v161_v60 }
  0x29   :  { %309 = vmatprep.subr.mxu0 %v423_v0  ;;  %341 = vmatpush3.msra.mxu1 %v177_v22 }
  0x2a   :  { %310 = vmatpush3.msra.mxu0 %v55_v7  ;;  %342 = vmatprep.subr.mxu1 %v423_v0 }
  0x2b   :  { %311 = vmatprep.subr.mxu0 %v423_v0  ;;  %343 = vmatpush3.msra.mxu1 %v176_v23 }
  0x2c   :  { %312 = vmatpush3.msra.mxu0 %v54_v8  ;;  %344 = vmatprep.subr.mxu1 %v423_v0 }
  0x2d   :  { %313 = vmatprep.subr.mxu0 %v423_v0  ;;  %345 = vmatpush3.msra.mxu1 %v175_v24 }
  0x2e   :  { %314 = vmatpush3.msra.mxu0 %v53_v9  ;;  %346 = vmatprep.subr.mxu1 %v423_v0 }
  0x2f   :  { %315 = vmatprep.subr.mxu0 %v423_v0  ;;  %347 = vmatpush3.msra.mxu1 %v174_v25 }
  0x30   :  { %316 = vmatpush3.msra.mxu0 %v52_v10  ;;  %348 = vmatprep.subr.mxu1 %v423_v0 }
  0x31   :  { %317 = vmatprep.subr.mxu0 %v423_v0  ;;  %349 = vmatpush3.msra.mxu1 %v173_v26 }
  0x32   :  { %318 = vmatpush3.msra.mxu0 %v51_v11  ;;  %350 = vmatprep.subr.mxu1 %v423_v0 }
  0x33   :  { %319 = vmatprep.subr.mxu0 %v423_v0  ;;  %351 = vmatpush3.msra.mxu1 %v172_v27 }
  0x34   :  { %320 = vmatpush3.msra.mxu0 %v50_v12  ;;  %352 = vmatprep.subr.mxu1 %v423_v0 }
  0x35   :  { %321 = vmatprep.subr.mxu0 %v423_v0  ;;  %353 = vmatpush3.msra.mxu1 %v171_v28 }
  0x36   :  { %322 = vmatpush3.msra.mxu0 %v49_v13  ;;  %354 = vmatprep.subr.mxu1 %v423_v0 }
  0x37   :  { %323 = vmatprep.subr.mxu0 %v423_v0  ;;  %355 = vmatpush3.msra.mxu1 %v170_v29 }
  0x38   :  { %324 = vmatpush3.msra.mxu0 %v48_v14  ;;  %356 = vmatprep.subr.mxu1 %v423_v0 }
  0x39   :  { %325 = vmatprep.subr.mxu0 %v423_v0  ;;  %357 = vmatpush3.msra.mxu1 %v169_v30 }
  0x3a   :  { %326 = vmatpush3.msra.mxu0 %v47_v15  ;;  %358 = vmatprep.subr.mxu1 %v423_v0 }
  0x3b   :  { %327 = vmatprep.subr.mxu0 %v423_v0  ;;  %359 = vmatpush3.msra.mxu1 %v168_v31 }
  0x3c   :  { %328 = vmatpush3.msra.mxu0 %v46_v16  ;;  %360 = vmatprep.subr.mxu1 %v423_v0 }
  0x3d   :  { %330 = vmatmul.mubr.f32.vlgmr.msra.gmra.mxu0 %v45_v17  ;;  %361 = vmatpush3.msra.mxu1 %v167_v32 }
  0x3e   :  { %362 = vmatprep.subr.mxu1 %v423_v0 }
  0x3f   :  { %363 = vmatpush3.msra.mxu1 %v166_v34 }
  0xfd   :  { %v128_v39 = vpop.f32.mrf.mxu0 }
  0xfe   :  { %v132_v40 = vrot.slane %v128_v39, 4  ;;  %v139_v41 = vmul.f32 %v128_v39, %v128_v39 }
  0xff   :  { %v331_v42 = vpop.f32.mrf.mxu0 }
 0x100   :  { %v133_v43 = vadd.f32 %v132_v40, %v128_v39  ;;  %v140_v44 = vrot.slane %v139_v41, 4 }
 0x102   :  { %v134_v45 = vrot.slane %v133_v43, 2  ;;  %v141_v46 = vadd.f32 %v140_v44, %v139_v41 }
 0x104   :  { %v135_v47 = vadd.f32 %v134_v45, %v133_v43  ;;  %v142_v48 = vrot.slane %v141_v46, 2 }
 0x106   :  { %v136_v49 = vrot.slane %v135_v47, 1  ;;  %v143_v50 = vadd.f32 %v142_v48, %v141_v46 }
 0x108   :  { %v137_v51 = vadd.f32 %v136_v49, %v135_v47  ;;  %v144_v52 = vrot.slane %v143_v50, 1 }
 0x10a   :  { %v138_v53 = vmul.f32 0.125, %v137_v51  ;;  %v145_v54 = vadd.f32 %v144_v52, %v143_v50 }
 0x10c   :  { %v146_v55 = vmul.f32 0.125, %v145_v54  ;;  %v147_v56 = vmul.f32 %v138_v53, %v138_v53  ;;  %v150_v61 = vsub.f32 %v128_v39, %v138_v53 }
 0x10e   :  { %v148_v57 = vsub.f32 %v146_v55, %v147_v56 }
 0x110   :  { %v151_v58 = vadd.f32 1e-05, %v148_v57 }
 0x112   :  { %373 = vrsqrt.f32 %v151_v58 }
 0x11f   :  { %v374_v63 = vpop.eup %373 }
 0x120   :  { %v153_v0 = vmul.f32 %v374_v63, %v150_v61 }
 0x122   :  { %v158_v2 = vmul.f32 %v157_v62, %v153_v0 }
 0x124   :  { %v163_v3 = vadd.f32 %v162_v1, %v158_v2 }
 0x126   :  { %v164_v4 = vmul.f32 0.3, %v163_v3 }
 0x128   :  { %v165_v5 = vmax.f32 %v163_v3, %v164_v4 }
 0x12a   :  { %365 = vmatmul.mubr.f32.vlgmr.msra.gmra.mxu1 %v165_v5 }
 0x1ea   :  { %v252_v6 = vpop.f32.mrf.mxu1 }
 0x1eb   :  { %v253_v7 = vadd.f32 %v252_v6, %v185_v38 }
 0x1ec   :  { %v366_v8 = vpop.f32.mrf.mxu1 }
 0x1ed   :  { %256 = vst [vmem:[%s503_s4] sm:$0xff] %v253_v7 }
 0x1ee   :  { %261 = vsyncpa [#allocation3], 1 }
 0x1ef   :  { %262 = vsyncpa [#allocation5], 1 }

</bundles_post_ra>
